<compile_context>
chip_gen: v7x
topology: tpu7x:2x2x1
jax: 0.10.0
libtpu: 0.0.40
codegen_flags: <defaults>
</compile_context>

<pallas_src>
import functools

import jax
import jax.numpy as jnp
from jax.experimental import pallas as pl
from jax.experimental.pallas import tpu as pltpu

EPS = 1e-5


# ---------------------------------------------------------------------------
# Pass 1: per-channel statistics + folded conditional scale / shift.
# ---------------------------------------------------------------------------
def _stats_kernel(x_ref, c_ref, wg_ref, bg_ref, wb_ref, bb_ref,
                  scale_ref, shift_ref, sum_ref, sq_ref, *, eps, inv_n):
    b = pl.program_id(0)
    l = pl.program_id(1)

    @pl.when(jnp.logical_and(b == 0, l == 0))
    def _init():
        sum_ref[...] = jnp.zeros_like(sum_ref)
        sq_ref[...] = jnp.zeros_like(sq_ref)

    x = x_ref[...].astype(jnp.float32)           # (1, F, Lt)
    sum_ref[...] += jnp.sum(x, axis=2)           # (1, F)  -- F stays lane-resident
    sq_ref[...] += jnp.sum(x * x, axis=2)        # (1, F)

    is_last = jnp.logical_and(b == pl.num_programs(0) - 1,
                              l == pl.num_programs(1) - 1)

    @pl.when(is_last)
    def _finalize():
        mean = sum_ref[...] * inv_n                                    # (1, F)
        var = jnp.maximum(sq_ref[...] * inv_n - mean * mean, 0.0)      # (1, F)
        inv_std = jax.lax.rsqrt(var + eps)                             # (1, F)
        # Conditional affine params: tiny (B, C) @ (C, F) matmuls, done exactly once.
        gamma = jnp.dot(c_ref[...], wg_ref[...],
                        preferred_element_type=jnp.float32) + bg_ref[...]   # (B, F)
        beta = jnp.dot(c_ref[...], wb_ref[...],
                       preferred_element_type=jnp.float32) + bb_ref[...]    # (B, F)
        scale = gamma * inv_std                                        # (B, F)
        shift = beta - scale * mean                                    # (B, F)
        scale_ref[...] = scale                                         # lane-dense (B, F)
        shift_ref[...] = shift                                         # lane-dense (B, F)


# ---------------------------------------------------------------------------
# Pass 2: out = scale * x + shift (folded normalize + affine, 2 ops / element).
# ---------------------------------------------------------------------------
def _apply_kernel(x_ref, scale_ref, shift_ref, o_ref):
    x = x_ref[...].astype(jnp.float32)           # (1, F, Lt)
    o_ref[...] = (x * scale_ref[...] + shift_ref[...]).astype(o_ref.dtype)


def _choose_l_tile(f_dim, length, budget_bytes=4 * 1024 * 1024):
    """Largest multiple-of-128 divisor of L whose f32 (1, F, tile) block fits the
    per-block VMEM budget; falls back to a single full-L block otherwise."""
    if length % 128 != 0:
        # TODO(synk): very large L that is not a multiple of 128 would need
        # masked/padded tiles; here it falls back to one full-L block per batch.
        return length
    budget_elems = max(128, budget_bytes // (4 * f_dim))
    best = 128
    t = 128
    while t <= length:
        if length % t == 0 and t <= budget_elems:
            best = t
        t += 128
    return best


def cbatchnorm1d_legacy(x, c, wg, bg, wb, bb, *, eps=EPS):
    """x: (B, F, L), c: (B, C), wg/wb: (F, C), bg/bb: (F,)."""
    B, F, L = x.shape
    C = c.shape[-1]

    # Layout plumbing in the wrapper (keeps the hot kernels clean): pre-transpose
    # the Linear weights to (C, F), make the biases lane-dense (1, F).
    wg_t = jnp.asarray(wg, jnp.float32).T
    wb_t = jnp.asarray(wb, jnp.float32).T
    bg2 = jnp.asarray(bg, jnp.float32).reshape(1, F)
    bb2 = jnp.asarray(bb, jnp.float32).reshape(1, F)
    c32 = jnp.asarray(c, jnp.float32)

    l_tile = _choose_l_tile(F, L)
    n_l = L // l_tile
    f32_bytes = 4

    # ---- pass 1: statistics + folded scale / shift ------------------------
    scale, shift = pl.pallas_call(
        functools.partial(_stats_kernel, eps=eps, inv_n=1.0 / float(B * L)),
        grid_spec=pltpu.PrefetchScalarGridSpec(
            num_scalar_prefetch=0,
            grid=(B, n_l),
            in_specs=[
                pl.BlockSpec((1, F, l_tile), lambda b, l: (b, 0, l)),   # x
                pl.BlockSpec((B, C), lambda b, l: (0, 0)),              # c
                pl.BlockSpec((C, F), lambda b, l: (0, 0)),              # Wg^T
                pl.BlockSpec((1, F), lambda b, l: (0, 0)),              # bg
                pl.BlockSpec((C, F), lambda b, l: (0, 0)),              # Wb^T
                pl.BlockSpec((1, F), lambda b, l: (0, 0)),              # bb
            ],
            out_specs=[
                pl.BlockSpec((B, F), lambda b, l: (0, 0)),              # scale (B, F)
                pl.BlockSpec((B, F), lambda b, l: (0, 0)),              # shift (B, F)
            ],
            scratch_shapes=[
                pltpu.VMEM((1, F), jnp.float32),                        # running sum
                pltpu.VMEM((1, F), jnp.float32),                        # running sum of squares
            ],
        ),
        out_shape=[
            jax.ShapeDtypeStruct((B, F), jnp.float32),
            jax.ShapeDtypeStruct((B, F), jnp.float32),
        ],
        compiler_params=pltpu.CompilerParams(
            dimension_semantics=("arbitrary", "arbitrary"),
            vmem_limit_bytes=32 * 1024 * 1024,
        ),
        cost_estimate=pl.CostEstimate(
            flops=3 * B * F * L + 4 * B * C * F + 8 * B * F,
            transcendentals=F,
            bytes_accessed=x.size * x.dtype.itemsize
            + f32_bytes * (B * C + 2 * C * F + 2 * F + 2 * B * F),
        ),
    )(x, c32, wg_t, bg2, wb_t, bb2)

    # Tiny reshape in XLA so pass 2 sees sublane-resident (B, F, 1) scale/shift
    # that lane-broadcasts for free against the (1, F, L_tile) x blocks.
    scale3 = scale[:, :, None]
    shift3 = shift[:, :, None]

    # ---- pass 2: out = scale * x + shift -----------------------------------
    out = pl.pallas_call(
        _apply_kernel,
        grid_spec=pltpu.PrefetchScalarGridSpec(
            num_scalar_prefetch=0,
            grid=(B, n_l),
            in_specs=[
                pl.BlockSpec((1, F, l_tile), lambda b, l: (b, 0, l)),   # x
                pl.BlockSpec((1, F, 1), lambda b, l: (b, 0, 0)),        # scale
                pl.BlockSpec((1, F, 1), lambda b, l: (b, 0, 0)),        # shift
            ],
            out_specs=pl.BlockSpec((1, F, l_tile), lambda b, l: (b, 0, l)),
        ),
        out_shape=jax.ShapeDtypeStruct((B, F, L), x.dtype),
        compiler_params=pltpu.CompilerParams(
            dimension_semantics=("parallel", "parallel"),
            vmem_limit_bytes=32 * 1024 * 1024,
        ),
        cost_estimate=pl.CostEstimate(
            flops=2 * B * F * L,
            transcendentals=0,
            bytes_accessed=2 * x.size * x.dtype.itemsize + 2 * f32_bytes * B * F,
        ),
    )(x, scale3, shift3)

    return out


# ---------------------------------------------------------------------------
# Pure-JAX reference and self-test.
# ---------------------------------------------------------------------------
def _reference(x, c, wg, bg, wb, bb):
    gamma = c @ wg.T + bg
    beta = c @ wb.T + bb
    mean = jnp.mean(x, axis=(0, 2), keepdims=True)
    var = jnp.mean((x - mean) ** 2, axis=(0, 2), keepdims=True)
    net = (x - mean) / jnp.sqrt(var + EPS)
    return gamma[:, :, None] * net + beta[:, :, None]


def _run_case(key, *, B, C, F, L, tol):
    k_x, k_c, k_wg, k_wb = jax.random.split(key, 4)
    x = jax.random.normal(k_x, (B, F, L), dtype=jnp.float32)
    c = jax.random.normal(k_c, (B, C), dtype=jnp.float32)
    # reset_parameters() would give wg=wb=0, bg=1, bb=0 (identity conditioning);
    # use small random weights plus that bias scheme so conditioning is exercised.
    wg = 0.1 * jax.random.normal(k_wg, (F, C), dtype=jnp.float32)
    bg = jnp.ones((F,), dtype=jnp.float32)
    wb = 0.1 * jax.random.normal(k_wb, (F, C), dtype=jnp.float32)
    bb = jnp.zeros((F,), dtype=jnp.float32)

    out = jax.block_until_ready(cbatchnorm1d_legacy(x, c, wg, bg, wb, bb))
    ref = _reference(x, c, wg, bg, wb, bb)
    assert out.shape == (B, F, L)
    assert jnp.allclose(out, ref, atol=tol, rtol=tol), \
        f"mismatch vs reference for shape {(B, F, L)}"


if __name__ == "__main__":
    key = jax.random.PRNGKey(0)
    k1, k2 = jax.random.split(key)
    # Small, module-sized case (L=16 < 128 -> full-L fallback block).
    _run_case(k1, B=2, C=8, F=4, L=16, tol=1e-5)
    # Lane-dense tiled case: per-batch slab (256 x 8192 f32 = 8 MiB) exceeds the
    # 4 MiB block budget -> L_tile=4096, grid (2, 2); exercises the pipelined
    # "arbitrary" reduction and the "parallel" normalize pass.
    _run_case(k2, B=2, C=8, F=256, L=8192, tol=5e-4)
    print("KERNEL_OK")
</pallas_src>

<mosaic_0001>
module attributes {stable_mosaic.version = 11 : i64} {
  func.func @_stats_kernel(%arg0: i32, %arg1: i32, %arg2: memref<1x4x16xf32, #tpu.memory_space<vmem>>, %arg3: memref<2x8xf32, #tpu.memory_space<vmem>>, %arg4: memref<8x4xf32, #tpu.memory_space<vmem>>, %arg5: memref<1x4xf32, #tpu.memory_space<vmem>>, %arg6: memref<8x4xf32, #tpu.memory_space<vmem>>, %arg7: memref<1x4xf32, #tpu.memory_space<vmem>>, %arg8: memref<2x4xf32, #tpu.memory_space<vmem>>, %arg9: memref<2x4xf32, #tpu.memory_space<vmem>>, %arg10: memref<1x4xf32, #tpu.memory_space<vmem>>, %arg11: memref<1x4xf32, #tpu.memory_space<vmem>>) attributes {dimension_semantics = [#tpu.dimension_semantics<arbitrary>, #tpu.dimension_semantics<arbitrary>], iteration_bounds = array<i64: 2, 1>, scalar_prefetch = 0 : i64, scratch_operands = 2 : i64, tpu.core_type = #tpu.core_type<tc>, window_params = [{transform_indices = @transform_0, window_bounds = array<i64: 1, 4, 16>}, {pipeline_mode = #tpu.pipeline_mode<synchronous>, transform_indices = @transform_1, window_bounds = array<i64: 2, 8>}, {pipeline_mode = #tpu.pipeline_mode<synchronous>, transform_indices = @transform_2, window_bounds = array<i64: 8, 4>}, {pipeline_mode = #tpu.pipeline_mode<synchronous>, transform_indices = @transform_3, window_bounds = array<i64: 1, 4>}, {pipeline_mode = #tpu.pipeline_mode<synchronous>, transform_indices = @transform_4, window_bounds = array<i64: 8, 4>}, {pipeline_mode = #tpu.pipeline_mode<synchronous>, transform_indices = @transform_5, window_bounds = array<i64: 1, 4>}, {pipeline_mode = #tpu.pipeline_mode<synchronous>, transform_indices = @transform_6, window_bounds = array<i64: 2, 4>}, {pipeline_mode = #tpu.pipeline_mode<synchronous>, transform_indices = @transform_7, window_bounds = array<i64: 2, 4>}]} {
    %c0_i32 = arith.constant 0 : i32
    %0 = arith.cmpi eq, %arg0, %c0_i32 : i32
    %c0_i32_0 = arith.constant 0 : i32
    %1 = arith.cmpi eq, %arg1, %c0_i32_0 : i32
    %2 = arith.andi %0, %1 : i1
    %3 = arith.extui %2 : i1 to i32
    %c0_i32_1 = arith.constant 0 : i32
    %4 = arith.cmpi ne, %3, %c0_i32_1 : i32
    scf.if %4 {
      %cst_15 = arith.constant 0.000000e+00 : f32
      %20 = vector.broadcast %cst_15 : f32 to vector<1x4xf32>
      %c0_16 = arith.constant 0 : index
      %c0_17 = arith.constant 0 : index
      %21 = vector.load %arg10[%c0_16, %c0_17] : memref<1x4xf32, #tpu.memory_space<vmem>>, vector<1x4xf32>
      tpu.vector_store %arg10[%c0_16, %c0_17], %20 {strides = array<i32>} : memref<1x4xf32, #tpu.memory_space<vmem>>, vector<1x4xf32>,
      %cst_18 = arith.constant 0.000000e+00 : f32
      %22 = vector.broadcast %cst_18 : f32 to vector<1x4xf32>
      %c0_19 = arith.constant 0 : index
      %c0_20 = arith.constant 0 : index
      %23 = vector.load %arg11[%c0_19, %c0_20] : memref<1x4xf32, #tpu.memory_space<vmem>>, vector<1x4xf32>
      tpu.vector_store %arg11[%c0_19, %c0_20], %22 {strides = array<i32>} : memref<1x4xf32, #tpu.memory_space<vmem>>, vector<1x4xf32>,
    } else {
    }
    %c0 = arith.constant 0 : index
    %c0_2 = arith.constant 0 : index
    %c0_3 = arith.constant 0 : index
    %5 = vector.load %arg2[%c0, %c0_2, %c0_3] : memref<1x4x16xf32, #tpu.memory_space<vmem>>, vector<1x4x16xf32>
    %c0_4 = arith.constant 0 : index
    %c0_5 = arith.constant 0 : index
    %6 = vector.load %arg10[%c0_4, %c0_5] : memref<1x4xf32, #tpu.memory_space<vmem>>, vector<1x4xf32>
    %cst = arith.constant dense<0.000000e+00> : vector<1x4xf32>
    %7 = vector.multi_reduction <add>, %5, %cst [2] : vector<1x4x16xf32> to vector<1x4xf32>
    %8 = arith.addf %6, %7 : vector<1x4xf32>
    %c0_6 = arith.constant 0 : index
    %c0_7 = arith.constant 0 : index
    %9 = vector.load %arg10[%c0_6, %c0_7] : memref<1x4xf32, #tpu.memory_space<vmem>>, vector<1x4xf32>
    tpu.vector_store %arg10[%c0_6, %c0_7], %8 {strides = array<i32>} : memref<1x4xf32, #tpu.memory_space<vmem>>, vector<1x4xf32>,
    %c0_8 = arith.constant 0 : index
    %c0_9 = arith.constant 0 : index
    %10 = vector.load %arg11[%c0_8, %c0_9] : memref<1x4xf32, #tpu.memory_space<vmem>>, vector<1x4xf32>
    %11 = arith.mulf %5, %5 : vector<1x4x16xf32>
    %cst_10 = arith.constant dense<0.000000e+00> : vector<1x4xf32>
    %12 = vector.multi_reduction <add>, %11, %cst_10 [2] : vector<1x4x16xf32> to vector<1x4xf32>
    %13 = arith.addf %10, %12 : vector<1x4xf32>
    %c0_11 = arith.constant 0 : index
    %c0_12 = arith.constant 0 : index
    %14 = vector.load %arg11[%c0_11, %c0_12] : memref<1x4xf32, #tpu.memory_space<vmem>>, vector<1x4xf32>
    tpu.vector_store %arg11[%c0_11, %c0_12], %13 {strides = array<i32>} : memref<1x4xf32, #tpu.memory_space<vmem>>, vector<1x4xf32>,
    %c1_i32 = arith.constant 1 : i32
    %15 = arith.cmpi eq, %arg0, %c1_i32 : i32
    %c0_i32_13 = arith.constant 0 : i32
    %16 = arith.cmpi eq, %arg1, %c0_i32_13 : i32
    %17 = arith.andi %15, %16 : i1
    %18 = arith.extui %17 : i1 to i32
    %c0_i32_14 = arith.constant 0 : i32
    %19 = arith.cmpi ne, %18, %c0_i32_14 : i32
    scf.if %19 {
      %c0_15 = arith.constant 0 : index
      %c0_16 = arith.constant 0 : index
      %20 = vector.load %arg10[%c0_15, %c0_16] : memref<1x4xf32, #tpu.memory_space<vmem>>, vector<1x4xf32>
      %cst_17 = arith.constant 3.125000e-02 : f32
      %21 = vector.broadcast %cst_17 : f32 to vector<1x4xf32>
      %22 = arith.mulf %20, %21 : vector<1x4xf32>
      %c0_18 = arith.constant 0 : index
      %c0_19 = arith.constant 0 : index
      %23 = vector.load %arg11[%c0_18, %c0_19] : memref<1x4xf32, #tpu.memory_space<vmem>>, vector<1x4xf32>
      %cst_20 = arith.constant 3.125000e-02 : f32
      %24 = vector.broadcast %cst_20 : f32 to vector<1x4xf32>
      %25 = arith.mulf %23, %24 : vector<1x4xf32>
      %26 = arith.mulf %22, %22 : vector<1x4xf32>
      %27 = arith.subf %25, %26 : vector<1x4xf32>
      %cst_21 = arith.constant 0.000000e+00 : f32
      %28 = vector.broadcast %cst_21 : f32 to vector<1x4xf32>
      %29 = arith.maximumf %27, %28 : vector<1x4xf32>
      %cst_22 = arith.constant 9.99999974E-6 : f32
      %30 = vector.broadcast %cst_22 : f32 to vector<1x4xf32>
      %31 = arith.addf %29, %30 : vector<1x4xf32>
      %32 = math.rsqrt %31 : vector<1x4xf32>
      %c0_23 = arith.constant 0 : index
      %c0_24 = arith.constant 0 : index
      %33 = vector.load %arg3[%c0_23, %c0_24] : memref<2x8xf32, #tpu.memory_space<vmem>>, vector<2x8xf32>
      %c0_25 = arith.constant 0 : index
      %c0_26 = arith.constant 0 : index
      %34 = vector.load %arg4[%c0_25, %c0_26] : memref<8x4xf32, #tpu.memory_space<vmem>>, vector<8x4xf32>
      %cst_27 = arith.constant dense<0.000000e+00> : vector<2x4xf32>
      %35 = tpu.matmul %33, %34, %cst_27 {dimension_numbers = #tpu.dot_dimension_numbers<[1], [0], [0], [1], [0, 0, 1, 1], [], []>} : vector<2x8xf32>, vector<8x4xf32>, vector<2x4xf32> -> vector<2x4xf32>
      %c0_28 = arith.constant 0 : index
      %c0_29 = arith.constant 0 : index
      %36 = vector.load %arg5[%c0_28, %c0_29] : memref<1x4xf32, #tpu.memory_space<vmem>>, vector<1x4xf32>
      %37 = vector.broadcast %36 : vector<1x4xf32> to vector<2x4xf32>
      %38 = arith.addf %35, %37 : vector<2x4xf32>
      %c0_30 = arith.constant 0 : index
      %c0_31 = arith.constant 0 : index
      %39 = vector.load %arg3[%c0_30, %c0_31] : memref<2x8xf32, #tpu.memory_space<vmem>>, vector<2x8xf32>
      %c0_32 = arith.constant 0 : index
      %c0_33 = arith.constant 0 : index
      %40 = vector.load %arg6[%c0_32, %c0_33] : memref<8x4xf32, #tpu.memory_space<vmem>>, vector<8x4xf32>
      %cst_34 = arith.constant dense<0.000000e+00> : vector<2x4xf32>
      %41 = tpu.matmul %39, %40, %cst_34 {dimension_numbers = #tpu.dot_dimension_numbers<[1], [0], [0], [1], [0, 0, 1, 1], [], []>} : vector<2x8xf32>, vector<8x4xf32>, vector<2x4xf32> -> vector<2x4xf32>
      %c0_35 = arith.constant 0 : index
      %c0_36 = arith.constant 0 : index
      %42 = vector.load %arg7[%c0_35, %c0_36] : memref<1x4xf32, #tpu.memory_space<vmem>>, vector<1x4xf32>
      %43 = vector.broadcast %42 : vector<1x4xf32> to vector<2x4xf32>
      %44 = arith.addf %41, %43 : vector<2x4xf32>
      %45 = vector.broadcast %32 : vector<1x4xf32> to vector<2x4xf32>
      %46 = arith.mulf %38, %45 : vector<2x4xf32>
      %47 = vector.broadcast %22 : vector<1x4xf32> to vector<2x4xf32>
      %48 = arith.mulf %46, %47 : vector<2x4xf32>
      %49 = arith.subf %44, %48 : vector<2x4xf32>
      %c0_37 = arith.constant 0 : index
      %c0_38 = arith.constant 0 : index
      %50 = vector.load %arg8[%c0_37, %c0_38] : memref<2x4xf32, #tpu.memory_space<vmem>>, vector<2x4xf32>
      tpu.vector_store %arg8[%c0_37, %c0_38], %46 {strides = array<i32>} : memref<2x4xf32, #tpu.memory_space<vmem>>, vector<2x4xf32>,
      %c0_39 = arith.constant 0 : index
      %c0_40 = arith.constant 0 : index
      %51 = vector.load %arg9[%c0_39, %c0_40] : memref<2x4xf32, #tpu.memory_space<vmem>>, vector<2x4xf32>
      tpu.vector_store %arg9[%c0_39, %c0_40], %49 {strides = array<i32>} : memref<2x4xf32, #tpu.memory_space<vmem>>, vector<2x4xf32>,
    } else {
    }
    return
  }
  func.func @transform_0(%arg0: i32, %arg1: i32) -> (i32, i32, i32) {
    %c0_i32 = arith.constant 0 : i32
    %c0_i32_0 = arith.constant 0 : i32
    return %arg0, %c0_i32, %arg1 : i32, i32, i32
  }
  func.func @transform_1(%arg0: i32, %arg1: i32) -> (i32, i32) {
    %c0_i32 = arith.constant 0 : i32
    %c0_i32_0 = arith.constant 0 : i32
    %c0_i32_1 = arith.constant 0 : i32
    return %c0_i32, %c0_i32_0 : i32, i32
  }
  func.func @transform_2(%arg0: i32, %arg1: i32) -> (i32, i32) {
    %c0_i32 = arith.constant 0 : i32
    %c0_i32_0 = arith.constant 0 : i32
    %c0_i32_1 = arith.constant 0 : i32
    return %c0_i32, %c0_i32_0 : i32, i32
  }
  func.func @transform_3(%arg0: i32, %arg1: i32) -> (i32, i32) {
    %c0_i32 = arith.constant 0 : i32
    %c0_i32_0 = arith.constant 0 : i32
    %c0_i32_1 = arith.constant 0 : i32
    return %c0_i32, %c0_i32_0 : i32, i32
  }
  func.func @transform_4(%arg0: i32, %arg1: i32) -> (i32, i32) {
    %c0_i32 = arith.constant 0 : i32
    %c0_i32_0 = arith.constant 0 : i32
    %c0_i32_1 = arith.constant 0 : i32
    return %c0_i32, %c0_i32_0 : i32, i32
  }
  func.func @transform_5(%arg0: i32, %arg1: i32) -> (i32, i32) {
    %c0_i32 = arith.constant 0 : i32
    %c0_i32_0 = arith.constant 0 : i32
    %c0_i32_1 = arith.constant 0 : i32
    return %c0_i32, %c0_i32_0 : i32, i32
  }
  func.func @transform_6(%arg0: i32, %arg1: i32) -> (i32, i32) {
    %c0_i32 = arith.constant 0 : i32
    %c0_i32_0 = arith.constant 0 : i32
    %c0_i32_1 = arith.constant 0 : i32
    return %c0_i32, %c0_i32_0 : i32, i32
  }
  func.func @transform_7(%arg0: i32, %arg1: i32) -> (i32, i32) {
    %c0_i32 = arith.constant 0 : i32
    %c0_i32_0 = arith.constant 0 : i32
    %c0_i32_1 = arith.constant 0 : i32
    return %c0_i32, %c0_i32_0 : i32, i32
  }
}

</mosaic_0001>

<bundles_post_ra>
// kernel: tpu_custom_call.1
= control target key start
LH: loop header
LB: loop body
LE: loop exit
PB: predicated region body
PF: predicated region fallthrough
CT: control target
= control target key end

     0   :  { %13 = vsyncpa [#allocation5], 0  ;;  %s1038_s0 = inlined_call_operand.vmem [shape: f32[2,4,16], index: 0, kind: input, shape index: {}]   ;;  %s1039_s1 = inlined_call_operand.vmem [shape: f32[2,8], index: 1, kind: input, shape index: {}]   ;;  %s1040_s2 = inlined_call_operand.vmem [shape: f32[8,4], index: 2, kind: input, shape index: {}]   ;;  %s1041_s3 = inlined_call_operand.vmem [shape: f32[1,4], index: 3, kind: input, shape index: {}]   ;;  %s1042_s4 = inlined_call_operand.vmem [shape: f32[8,4], index: 4, kind: input, shape index: {}]   ;;  %s1043_s5 = inlined_call_operand.vmem [shape: f32[1,4], index: 5, kind: input, shape index: {}]   ;;  %s1044_s6 = inlined_call_operand.hbm [shape: f32[2,4], index: 6, kind: output, shape index: {0}]   ;;  %s1045_s7 = inlined_call_operand.hbm [shape: f32[2,4], index: 7, kind: output, shape index: {1}]  }
   0x1   :  { %14 = vsyncpa [#allocation7], 0  ;;  %s921_s24 = smov 0   ;;  %s923_s25 = smov 0  }
   0x2   :  { %s925_s26 = smov 0  }
   0x3 LB: > { %s710_s27 = sadd.s32 4294967295, %s872_s26   ;;  %s32_s28 = sadd.s32 1, %s868_s25  ;;  %s872_s26 = sphi %s925_s26, %s20_s26   ;;  %s868_s25 = sphi %s923_s25, %s1048_s25   ;;  %s864_s24 = sphi %s921_s24, %s1047_s24  }
   0x4   : > { %p34_p0 = scmp.ge.s32.totalorder %s32_s28, 2  ;;  %p713_p1 = scmp.ge.s32.totalorder %s872_s26, 1 }
   0x5   : > { %p248_p2 = scmp.lt.s32.totalorder %s872_s26, 3 }
   0x6   : > { %s1050_s28 = smov (%p34_p0, %s32_s28), 0 }
   0x7   : > { %p249_p3 = pnand %p713_p1, %p248_p2 }
   0x8   : > { %p277_p4 = scmp.lt.s32.totalorder (!%p249_p3), %s864_s24, 1  ;;  %p284_p5 = scmp.eq.s32.totalorder (!%p249_p3), %s864_s24, 0 }
   0x9   : > { %252 = sbr.rel (%p249_p3) target bundleno = 403 (0x193), region = 44 }
  0x10   : > { %s278_s29 = scalar_select %p277_p4, %s864_s24, 1 }
  0x11   : > { %289 = sbr.rel (!%p284_p5) target bundleno = 24 (0x18), region = 48  ;;  %vm290_vm0 = vcmask (%p284_p5), 24576   ;;  %v874_v0 = vmov (%p284_p5), 0.0  }
  0x12   : > { %s714_s30 = sshll.u32 %s278_s29, 2  ;;  %291 = vst.msk [vmem:[#allocation2] sm:$0x1] (%p284_p5), %vm290_vm0, %v874_v0  ;;  %292 = vst.msk [vmem:[#allocation3] sm:$0x1] (%p284_p5), %vm290_vm0, %v874_v0 }
  0x13   : > { %s283_s10 = scalar_lea.vmem %s1038_s0, %s714_s30 }
  0x18 PF: > { %v293_v1 = vld [vmem:[%s283_s10] sm:$0xf]  ;;  %vm295_vm1 = vcmask 125952   ;;  %v875_v5 = vmov 0   ;;  %v300_v6 = vlaneseq  ;;  %v876_v10 = vmov 1966171168  }
  0x19   : > { %v296_v2 = vsel %vm295_vm1, %v293_v1, 0.0  ;;  %v368_v3 = vmul.f32 %v293_v1, %v293_v1  ;;  %786 = vset.pattern.permute.xlu1 %v875_v5  ;;  %787 = vset.pattern.permute.xlu0 %v875_v5  ;;  %v319_v11 = vunpack.c.l.s4 %v876_v10  ;;  %p437_p6 = scmp.eq.s32.totalorder %s864_s24, 1  ;;  %v294_v43 = vld [vmem:[#allocation2] sm:$0x1]  ;;  %vm365_vm2 = vcmask 24576  }
  0x1a   : > { %297 = vadd.xlane.f32.xlu0 %v296_v2  ;;  %v301_v7 = vshrl.u32 %v300_v6, 7  ;;  %v344_v8 = vand.u32 127, %v300_v6  ;;  %v367_v49 = vld [vmem:[#allocation3] sm:$0x1]  ;;  %vm460_vm3 = vcmask (%p437_p6), 64512   ;;  %v877_v54 = vmov (%p437_p6), 0.0  }
  0x1b   : > { %v369_v4 = vsel %vm295_vm1, %v368_v3, 0.0  ;;  %v320_v16 = vunpack.c.0.s8 %v319_v11  ;;  %v452_v52 = vld [vmem:[%s1040_s2] sm:$0xff] (%p437_p6)  ;;  %733 = vmatprep.subr.mxu0 (%p437_p6), %v877_v54  ;;  %vm878_vm4 = vmmov (%p437_p6), 0   ;;  %738 = vmatprep.subr.mxu1 (%p437_p6), %v877_v54  ;;  %vm627_vm5 = vcmask (%p437_p6), 25600  }
  0x1c   : > { %v347_v9 = vsub.s32 %v344_v8, %v301_v7  ;;  %v948_v12 = vsub.s32 0, %v301_v7  ;;  %v306_v13 = vsub.s32 1, %v301_v7  ;;  %v310_v14 = vsub.s32 2, %v301_v7  ;;  %v451_v53 = vld [vmem:[%s1039_s1] sm:$0x3] (%p437_p6)  ;;  %735 = vmatprep.mubr.msk.f32.mxu0 (%p437_p6), %vm878_vm4, %v877_v54  ;;  %734 = vmatpush3.msra.mxu0 (%p437_p6), %v452_v52 }
  0x1d   : > { %v314_v15 = vsub.s32 3, %v301_v7  ;;  %v323_v22 = vsub.s32 %v320_v16, %v301_v7  ;;  %v534_v55 = vld [vmem:[%s1042_s4] sm:$0xff] (%p437_p6)  ;;  %736 = vmatmul.mubr.msk.f32.vlgmr.msra.gmra.mrb[0].mxu0 (%p437_p6), %vm460_vm3, %v451_v53  ;;  %740 = vmatprep.mubr.msk.f32.mxu1 (%p437_p6), %vm878_vm4, %v877_v54 }
  0x1e   : > { %370 = vadd.xlane.f32.xlu0 %v369_v4  ;;  %739 = vmatpush3.msra.mxu1 (%p437_p6), %v534_v55  ;;  %v717_v1 = vld [vmem:[%s1041_s3] ss:$0 sm:$0xff] (%p437_p6) }
  0x1f   : > { %741 = vmatmul.mubr.msk.f32.vlgmr.msra.gmra.mrb[0].mxu1 (%p437_p6), %vm460_vm3, %v451_v53  ;;  %v719_v4 = vld [vmem:[%s1043_s5] ss:$0 sm:$0xff] (%p437_p6) }
  0xa7   : > { %v298_v17 = vpop.xlane.xlu0 %297 }
  0xa8   : > { %v303_v18 = vrot.slane %v298_v17, %v948_v12  ;;  %v307_v19 = vrot.slane %v298_v17, %v306_v13  ;;  %v311_v20 = vrot.slane %v298_v17, %v310_v14  ;;  %v315_v21 = vrot.slane %v298_v17, %v314_v15 }
  0xaa   : > { %v316_v23 = vcombine.low %v303_v18, %v307_v19  ;;  %v317_v24 = vcombine.low %v311_v20, %v315_v21 }
  0xab   : > { %v371_v25 = vpop.xlane.xlu0 %370 }
  0xac   : > { %v376_v26 = vrot.slane %v371_v25, %v948_v12  ;;  %v380_v27 = vrot.slane %v371_v25, %v306_v13  ;;  %v384_v28 = vrot.slane %v371_v25, %v310_v14  ;;  %v388_v29 = vrot.slane %v371_v25, %v314_v15 }
  0xad   : > { %v324_v30 = vrot.slane %v316_v23, %v323_v22  ;;  %v331_v31 = vrot.slane %v317_v24, %v323_v22 }
  0xae   : > { %v389_v32 = vcombine.low %v376_v26, %v380_v27  ;;  %v390_v33 = vcombine.low %v384_v28, %v388_v29 }
  0xaf   : > { %v332_v34 = vcombine.low %v324_v30, %v331_v31 }
  0xb0   : > { %v397_v35 = vrot.slane %v389_v32, %v323_v22  ;;  %v404_v36 = vrot.slane %v390_v33, %v323_v22 }
  0xb1   : > { %v339_v37 = vrot.slane %v332_v34, %v323_v22 }
  0xb2   : > { %v405_v38 = vcombine.low %v397_v35, %v404_v36 }
  0xb3   : > { %341 = vperm.xlu1 %786, %v339_v37  }
  0xb4   : > { %v412_v39 = vrot.slane %v405_v38, %v323_v22 }
  0xb7   : > { %414 = vperm.xlu1 %786, %v412_v39  }
  0xf0   : > { %v530_v3 = vpop.f32.mrb[0].mxu0 (%p437_p6) }
  0xf1   : > { %v531_v5 = vadd.f32 (%p437_p6), %v717_v1, %v530_v3  ;;  %v737_v6 = vpop.f32.mrb[1].mxu0 (%p437_p6) }
  0xf2   : > { %v608_v8 = vpop.f32.mrb[0].mxu1 (%p437_p6) }
  0xf3   : > { %v609_v10 = vadd.f32 (%p437_p6), %v719_v4, %v608_v8  ;;  %v742_v11 = vpop.f32.mrb[1].mxu1 (%p437_p6) }
 0x132   : > { %v342_v40 = vpop.permute.xlu1 %341 }
 0x133   : > { %v348_v41 = vrot.slane %v342_v40, %v347_v9 }
 0x135   : > { %v355_v42 = vrot.slane %v348_v41, %v323_v22 }
 0x136   : > { %v415_v44 = vpop.permute.xlu1 %414 }
 0x137   : > { %v362_v45 = vrot.slane %v355_v42, %v323_v22  ;;  %v419_v46 = vrot.slane %v415_v44, %v347_v9 }
 0x139   : > { %v364_v47 = vadd.f32 %v362_v45, %v294_v43  ;;  %v426_v48 = vrot.slane %v419_v46, %v323_v22  ;;  %441 = sbr.rel (!%p437_p6) target bundleno = 355 (0x163), region = 52 }
 0x13b   : > { %366 = vst.msk [vmem:[#allocation2] sm:$0x1] %vm365_vm2, %v364_v47  ;;  %v433_v50 = vrot.slane %v426_v48, %v323_v22 }
 0x13d   : > { %v435_v51 = vadd.f32 %v433_v50, %v367_v49 }
 0x13f   : > { %436 = vst.msk [vmem:[#allocation3] sm:$0x1] %vm365_vm2, %v435_v51 }
 0x142   : > { %v442_v56 = vld [vmem:[#allocation2] sm:$0x1] }
 0x143   : > { %v443_v57 = vmul.f32 0.03125, %v442_v56 }
 0x145   : > { %v446_v60 = vmul.f32 %v443_v57, %v443_v57  ;;  %v623_v7 = vrot.slane %v443_v57, %v948_v12 }
 0x146   : > { %v444_v58 = vld [vmem:[#allocation3] sm:$0x1] }
 0x147   : > { %v445_v59 = vmul.f32 0.03125, %v444_v58 }
 0x149   : > { %v447_v61 = vsub.f32 %v445_v59, %v446_v60 }
 0x14b   : > { %v448_v62 = vmax.f32 %v447_v61, 0.0 }
 0x14d   : > { %v449_v63 = vadd.f32 1e-05, %v448_v62 }
 0x14f   : > { %788 = vrsqrt.f32 %v449_v63 }
 0x159   : > { %v789_v0 = vpop.eup %788 }
 0x15a   : > { %v616_v2 = vrot.slane %v789_v0, %v948_v12 }
 0x15c   : > { %v618_v9 = vmul.f32 %v616_v2, %v531_v5 }
 0x15e   : > { %628 = vst.msk [vmem:[#allocation4] sm:$0x3] %vm627_vm5, %v618_v9  ;;  %v625_v13 = vmul.f32 %v623_v7, %v618_v9 }
 0x160   : > { %v626_v14 = vsub.f32 %v609_v10, %v625_v13 }
 0x162   : > { %629 = vst.msk [vmem:[#allocation6] sm:$0x3] %vm627_vm5, %v626_v14 }
 0x163 PF: > { %p974_p7 = scmp.eq.s32.totalorder %s710_s27, 1  ;;  %s879_s22 = smov [#allocation4]  }
 0x164   : > { %s637_s23 = sshll.u32 %s879_s22, 4  ;;  %s880_s24 = smov [#allocation6]   ;;  %s638_s23 = int_to_ptr.vmem [resolvable:$true] %s637_s23 }
 0x165   : > { %s648_s29 = sshll.u32 %s880_s24, 4  ;;  %s790_s30 = scalar_lea.vmem %s638_s23, 32  ;;  %s978_s29 = int_to_ptr.vmem [resolvable:$true] %s648_s29 }
 0x166   : > { %p791_p8 = scmp.ne.s32.totalorder %s638_s23, %s790_s30  ;;  %p797_p11 = scmp.lt.s32.totalorder %s638_s23, %s638_s23 }
 0x167   : > { %p798_p12 = scmp.lt.s32.totalorder %s790_s30, %s790_s30 }
 0x168   : > { %p792_p9 = pnand %p791_p8, %p974_p7 }
 0x169   : > { %p799_p13 = por %p798_p12, %p797_p11 }
 0x16a   : > { %p793_p10 = pneg %p792_p9 }
 0x16c   : > { %p800_p0 = pnand %p799_p13, %p793_p10 }
 0x16e   : > { %803 = shalt.err (!%p800_p0)
}
 0x16f   : > { %s804_s9 = scalar_lea.hbm %s1044_s6, 32 }
 0x170   : > { %p805_p1 = scmp.ne.s32.totalorder %s1044_s6, %s804_s9  ;;  %p810_p4 = scmp.lt.u32.totalorder %s804_s9, %s1044_s6 }
 0x172   : > { %p806_p2 = pnand %p805_p1, %p974_p7 }
 0x174   : > { %p807_p3 = pneg %p806_p2 }
 0x176   : > { %p812_p5 = pnand %p810_p4, %p807_p3 }
 0x178   : > { %815 = shalt.err (!%p812_p5)
}
 0x179   : > { %744 = dma.vmem_to_hbm [thread:$0]  (%p974_p7), %s638_s23, 32, %s1044_s6, [#allocation5]  }
 0x17a   : > { %s816_s16 = scalar_lea.vmem %s978_s29, 32  ;;  %p823_p10 = scmp.lt.s32.totalorder %s978_s29, %s978_s29 }
 0x17b   : > { %p817_p6 = scmp.ne.s32.totalorder %s978_s29, %s816_s16  ;;  %p824_p11 = scmp.lt.s32.totalorder %s816_s16, %s816_s16 }
 0x17d   : > { %p818_p8 = pnand %p817_p6, %p974_p7  ;;  %p825_p12 = por %p824_p11, %p823_p10 }
 0x17f   : > { %p819_p9 = pneg %p818_p8 }
 0x181   : > { %p826_p13 = pnand %p825_p12, %p819_p9 }
 0x183   : > { %829 = shalt.err (!%p826_p13)
}
 0x184   : > { %s830_s19 = scalar_lea.hbm %s1045_s7, 32 }
 0x185   : > { %p831_p0 = scmp.ne.s32.totalorder %s1045_s7, %s830_s19  ;;  %p836_p3 = scmp.lt.u32.totalorder %s830_s19, %s1045_s7 }
 0x187   : > { %p832_p1 = pnand %p831_p0, %p974_p7 }
 0x189   : > { %p833_p2 = pneg %p832_p1 }
 0x18b   : > { %p838_p4 = pnand %p836_p3, %p833_p2 }
 0x18d   : > { %841 = shalt.err (!%p838_p4)
}
 0x18e   : > { %746 = dma.vmem_to_hbm [thread:$0]  (%p974_p7), %s978_s29, 32, %s1045_s7, [#allocation7]  }
 0x18f   : > { %855 = dma.done.wait (%p974_p7), [#allocation5], 32  }
 0x190   : > { %857 = vsyncadd (%p974_p7), [#allocation5], 4294967264 }
 0x191   : > { %859 = dma.done.wait (%p974_p7), [#allocation7], 32  }
 0x192   : > { %861 = vsyncadd (%p974_p7), [#allocation7], 4294967264 }
 0x193 PF: > { %s20_s26 = sadd.s32 1, %s872_s26   ;;  %s1047_s24 = smov %s868_s25 }
 0x194   : > { %p17_p5 = scmp.ge.s32.totalorder %s20_s26, 4   ;;  %s1048_s25 = smov %s1050_s28 }
 0x196   :  { %19 = sbr.rel (!%p17_p5) target bundleno = 3 (0x3), region = 87 }
 0x19d   :  { %665 = vsyncpa [#allocation5], 1 }
 0x19e   :  { %667 = vsyncpa [#allocation5 + $0x1], 1 }
 0x19f   :  { %668 = vsyncpa [#allocation7], 1 }

</bundles_post_ra>
